<compile_context>
chip_gen: v7x
topology: tpu7x:2x2x1
jax: 0.10.0
libtpu: 0.0.40
codegen_flags: <defaults>
</compile_context>

<pallas_src>
import numpy as np
import jax
import jax.numpy as jnp
from jax.experimental import pallas as pl
from jax.experimental.pallas import tpu as pltpu

GRAVITY = 9.80665
RAD_EARTH = 6371000.0


def grid_area(lat2d_deg, lon2d_deg):
    """Deterministic spherical grid-cell area (m^2) from 2-D lat/lon in degrees (float64)."""
    lat_rad = np.deg2rad(lat2d_deg[:, 0].astype(np.float64))
    lon_rad = np.deg2rad(lon2d_deg[0, :].astype(np.float64))
    dlat = np.abs(np.gradient(lat_rad))
    dlon = np.abs(np.gradient(lon_rad))
    area = (RAD_EARTH ** 2) * np.cos(np.deg2rad(lat2d_deg.astype(np.float64)))
    area = area * dlat[:, None] * dlon[None, :]
    return area


def _trapz_weights(dp, s, e):
    """Weights w (len e-s) s.t. sum_l w[l-s]*x[l] == sum_{l=s}^{e-2} 0.5*(x[l]+x[l+1])*dp[l]."""
    w = np.zeros(e - s, dtype=np.float64)
    for lvl in range(s, e - 1):
        w[lvl - s] += 0.5 * dp[lvl]
        w[lvl + 1 - s] += 0.5 * dp[lvl]
    return w


def _make_mass_fix_kernel(w_full, w_hold, w_fix, c_num, c_fix, ind_fix_start):
    """Per-batch mass-fix kernel. All weights/constants are static f64->Python floats."""
    w_full = tuple(float(v) for v in w_full)
    w_hold = tuple(float(v) for v in w_hold)
    w_fix = tuple(float(v) for v in w_fix)
    c_num = float(c_num)
    c_fix = float(c_fix)

    def kernel(qi_ref, qp_ref, area_ref, out_ref):
        # qi_ref, qp_ref: (L, S) model dtype; area_ref: (1, S) f32 (normalized,
        # zero on padded lanes); out_ref: (L - ind_fix_start, S) model dtype.
        area = area_ref[...]
        qi = qi_ref[...].astype(jnp.float32)
        qp = qp_ref[...].astype(jnp.float32)

        def weighted_levels(x, weights, start):
            acc = jnp.float32(weights[0]) * x[start:start + 1, :]
            for i in range(1, len(weights)):
                acc = acc + jnp.float32(weights[i]) * x[start + i:start + i + 1, :]
            return acc

        # one global reduction per integral (area already carries the zero pad)
        s_t0 = jnp.sum(weighted_levels(qi, w_full, 0) * area)
        s_hold = jnp.sum(weighted_levels(qp, w_hold, 0) * area)
        s_fix = jnp.sum(weighted_levels(qp, w_fix, ind_fix_start) * area)

        # ratio = (mass_dry_t0 - mass_dry_t1_hold) / mass_dry_t1_fix; the constant
        # "1 - q -> 1" parts are exact host-side f64 constants, gravity and the
        # total area cancel.
        # TODO(synk): no guard on a zero denominator, matching the reference.
        ratio = (jnp.float32(c_num) - s_t0 + s_hold) / (jnp.float32(c_fix) - s_fix)

        qp_fix = qp[ind_fix_start:, :]
        out_ref[...] = (1.0 - (1.0 - qp_fix) * ratio).astype(out_ref.dtype)

    return kernel


def global_mass_fix_q(q_input, q_pred, area_n, w_full, w_hold, w_fix, c_num, c_fix,
                      ind_fix_start):
    """q_input, q_pred: (B, L, H, W) model dtype; area_n: (H, W) f32 normalized.

    Returns the corrected-levels slab (B, L - ind_fix_start, H, W) in q_pred dtype."""
    B, L, H, W = q_pred.shape
    S = H * W
    S_pad = ((S + 127) // 128) * 128          # lane-dense, unmasked stores
    n_fix = L - ind_fix_start

    def flat_pad(x):
        x = x.reshape(B, L, S)
        if S_pad != S:
            x = jnp.pad(x, ((0, 0), (0, 0), (0, S_pad - S)))
        return x

    qi = flat_pad(q_input)
    qp = flat_pad(q_pred)
    area = area_n.reshape(1, S).astype(jnp.float32)
    if S_pad != S:
        area = jnp.pad(area, ((0, 0), (0, S_pad - S)))   # zero pad -> no reduction bias

    kernel = _make_mass_fix_kernel(w_full, w_hold, w_fix, c_num, c_fix, ind_fix_start)

    # VMEM estimate for the monolithic per-batch block (x2 for double buffering).
    itemsize = jnp.dtype(q_pred.dtype).itemsize
    block_bytes = (2 * L + n_fix) * S_pad * itemsize + S_pad * 4
    compiler_kwargs = dict(dimension_semantics=("parallel",))
    if 2 * block_bytes > 12 * (1 << 20):
        # TODO(synk): at production resolutions (e.g. 721x1440 on v7x) switch to a
        # lat-tiled two-phase reduce-then-apply design instead of bumping VMEM.
        compiler_kwargs["vmem_limit_bytes"] = int(min(4 * block_bytes, 96 << 20))

    out = pl.pallas_call(
        kernel,
        out_shape=jax.ShapeDtypeStruct((B, n_fix, S_pad), q_pred.dtype),
        grid=(B,),
        in_specs=[
            pl.BlockSpec((None, L, S_pad), lambda b: (b, 0, 0)),
            pl.BlockSpec((None, L, S_pad), lambda b: (b, 0, 0)),
            pl.BlockSpec((1, S_pad), lambda b: (0, 0)),
        ],
        out_specs=pl.BlockSpec((None, n_fix, S_pad), lambda b: (b, 0, 0)),
        compiler_params=pltpu.CompilerParams(**compiler_kwargs),
    )(qi, qp, area)

    return out[:, :, :S].reshape(B, n_fix, H, W)


class GlobalMassFixer:
    """JAX/Pallas port of credit.postblock.GlobalMassFixer (pressure-level path)."""

    def __init__(self, post_conf):
        conf = post_conf["global_mass_fixer"]
        if not conf["simple_demo"]:
            # TODO(synk): sigma-level / xarray-backed physics grids need external data files.
            raise NotImplementedError("only simple_demo pressure-level path supported")

        # simple_demo grid, identical to the PyTorch __init__
        y_demo = np.array([90, 70, 50, 30, 10, -10, -30, -50, -70, -90], dtype=np.float64)
        x_demo = np.arange(0, 360, 20, dtype=np.float64)   # 18 longitudes
        lon2d, lat2d = np.meshgrid(x_demo, y_demo)
        p_level = np.array([100, 30000, 50000, 70000, 80000, 90000, 100000], dtype=np.float64)

        self.flag_sigma_level = False
        self.flag_midpoint = bool(conf["midpoint"])
        if self.flag_midpoint:
            # TODO(synk): midpoint pressure-integral variant not wired into the kernel.
            raise NotImplementedError("midpoint=False only")

        self.p_level = p_level
        self.dp = np.diff(p_level)                          # pressure thickness (f64)
        self.N_levels = len(p_level)
        self.ind_fix = self.N_levels - int(conf["fix_level_num"]) + 1
        self.ind_fix_start = self.ind_fix if self.flag_midpoint else self.ind_fix - 1
        self.q_ind_start = int(conf["q_inds"][0])
        self.q_ind_end = int(conf["q_inds"][-1]) + 1

        # host-side f64 constants: cell areas, trapezoid level weights, and the
        # exact "1 - q -> 1" parts of the dry-mass integrals
        area64 = grid_area(lat2d, lon2d)                    # (lat, lon) f64
        self.area = jnp.asarray(area64, jnp.float32)        # raw, kept for reference/tests
        self.area_n = jnp.asarray(area64 / area64.sum(), jnp.float32)
        self.w_full = _trapz_weights(self.dp, 0, self.N_levels)
        self.w_hold = _trapz_weights(self.dp, 0, self.ind_fix)
        self.w_fix = _trapz_weights(self.dp, self.ind_fix_start, self.N_levels)
        self.c_num = float(self.w_full.sum() - self.w_hold.sum())
        self.c_fix = float(self.w_fix.sum())

        if conf["denorm"]:
            # TODO(synk): state_trans (de/re-normalization) requires external scaler files.
            raise NotImplementedError("denorm=False only")
        self.state_trans = None

    def __call__(self, x):
        x_input = x["x"]                         # (B, V, T_in, lat, lon)
        y_pred = x["y_pred"]                     # (B, V, 1, lat, lon)
        N_vars = y_pred.shape[1]

        # inputs stay in model dtype; the kernel casts to f32 internally
        q_input = x_input[:, self.q_ind_start:self.q_ind_end, -1]
        q_pred = y_pred[:, self.q_ind_start:self.q_ind_end, 0]

        q_fix = global_mass_fix_q(
            q_input, q_pred, self.area_n,
            self.w_full, self.w_hold, self.w_fix, self.c_num, self.c_fix,
            self.ind_fix_start,
        )
        q_new = jnp.concatenate([q_pred[:, :self.ind_fix_start], q_fix], axis=1)
        q_new = q_new[:, :, None]                # restore time dim -> (B, Lq, 1, lat, lon)

        # concat_fix (glue in plain JAX), same semantics as the torch helper
        parts = []
        if self.q_ind_start > 0:
            parts.append(y_pred[:, : self.q_ind_start])
        parts.append(q_new)
        if self.q_ind_end < N_vars - 1:
            if self.q_ind_start == self.q_ind_end:
                parts.append(y_pred[:, self.q_ind_end + 1:])
            else:
                parts.append(y_pred[:, self.q_ind_end:])
        y_new = jnp.concatenate(parts, axis=1)

        out = dict(x)
        out["y_pred"] = y_new
        return out


def _reference_forward(x_input, y_pred, area, dp, qs, qe, ind_fix, ind_fix_start):
    """float64 numpy reference of the non-sigma forward pass."""
    L = dp.shape[0] + 1
    q_input = x_input[:, qs:qe, -1]
    q_pred = y_pred[:, qs:qe, 0]

    def trapz(x, s, e):
        q_mid = 0.5 * (x[:, s:e - 1] + x[:, s + 1:e])
        return (q_mid * dp[s:e - 1][None, :, None, None]).sum(1)

    def wsum(d):
        return (d * area[None]).sum((-2, -1))

    t0 = wsum(trapz(1 - q_input, 0, L) / GRAVITY)
    hold = wsum(trapz(1 - q_pred, 0, ind_fix) / GRAVITY)
    fix = wsum(trapz(1 - q_pred, ind_fix_start, L) / GRAVITY)
    ratio = ((t0 - hold) / fix)[:, None, None, None]

    q_fix = 1 - (1 - q_pred[:, ind_fix_start:]) * ratio
    q_new = np.concatenate([q_pred[:, :ind_fix_start], q_fix], axis=1)[:, :, None]

    N_vars = y_pred.shape[1]
    parts = []
    if qs > 0:
        parts.append(y_pred[:, :qs])
    parts.append(q_new)
    if qe < N_vars - 1:
        parts.append(y_pred[:, qe + 1:] if qs == qe else y_pred[:, qe:])
    return np.concatenate(parts, axis=1)


if __name__ == "__main__":
    post_conf = {
        "global_mass_fixer": {
            "simple_demo": True,
            "midpoint": False,
            "denorm": False,
            "fix_level_num": 3,
            "q_inds": list(range(1, 8)),   # 7 specific-water channels -> indices 1..7
        }
    }
    fixer = GlobalMassFixer(post_conf)

    B, V, T_in, T_out = 2, 10, 2, 1
    H, W = 10, 18                      # simple_demo lat/lon grid
    key = jax.random.PRNGKey(0)
    k1, k2 = jax.random.split(key)
    # small humidity-like magnitudes so the correction ratio is well conditioned
    x_input = jax.random.uniform(k1, (B, V, T_in, H, W), jnp.float32) * 0.02
    y_pred = jax.random.uniform(k2, (B, V, T_out, H, W), jnp.float32) * 0.02

    out = fixer({"x": x_input, "y_pred": y_pred})
    y_fixed = jax.block_until_ready(out["y_pred"])

    # sanity check against a float64 numpy reference
    y_ref = _reference_forward(
        np.asarray(x_input, np.float64),
        np.asarray(y_pred, np.float64),
        np.asarray(fixer.area, np.float64),
        np.asarray(fixer.dp, np.float64),
        fixer.q_ind_start,
        fixer.q_ind_end,
        fixer.ind_fix,
        fixer.ind_fix_start,
    )
    assert y_fixed.shape == y_pred.shape
    assert np.allclose(np.asarray(y_fixed), y_ref, rtol=2e-3, atol=2e-3), "mismatch vs reference"
    print("KERNEL_OK")
</pallas_src>

<mosaic_0001>
module attributes {stable_mosaic.version = 11 : i64} {
  func.func @kernel(%arg0: i32, %arg1: memref<1x7x256xf32, #tpu.memory_space<vmem>>, %arg2: memref<1x7x256xf32, #tpu.memory_space<vmem>>, %arg3: memref<1x256xf32, #tpu.memory_space<vmem>>, %arg4: memref<1x3x256xf32, #tpu.memory_space<vmem>>) attributes {dimension_semantics = [#tpu.dimension_semantics<parallel>], iteration_bounds = array<i64: 2>, scalar_prefetch = 0 : i64, scratch_operands = 0 : i64, tpu.core_type = #tpu.core_type<tc>, window_params = [{transform_indices = @transform_0, window_bounds = array<i64: 1, 7, 256>}, {transform_indices = @transform_1, window_bounds = array<i64: 1, 7, 256>}, {pipeline_mode = #tpu.pipeline_mode<synchronous>, transform_indices = @transform_2, window_bounds = array<i64: 1, 256>}, {transform_indices = @transform_3, window_bounds = array<i64: 1, 3, 256>}]} {
    %c0 = arith.constant 0 : index
    %c0_0 = arith.constant 0 : index
    %0 = vector.load %arg3[%c0, %c0_0] : memref<1x256xf32, #tpu.memory_space<vmem>>, vector<1x256xf32>
    %c0_1 = arith.constant 0 : index
    %c0_2 = arith.constant 0 : index
    %c0_3 = arith.constant 0 : index
    %1 = vector.load %arg1[%c0_1, %c0_2, %c0_3] : memref<1x7x256xf32, #tpu.memory_space<vmem>>, vector<1x7x256xf32>
    %2 = vector.shape_cast %1 : vector<1x7x256xf32> to vector<7x256xf32>
    %c0_4 = arith.constant 0 : index
    %c0_5 = arith.constant 0 : index
    %c0_6 = arith.constant 0 : index
    %3 = vector.load %arg2[%c0_4, %c0_5, %c0_6] : memref<1x7x256xf32, #tpu.memory_space<vmem>>, vector<1x7x256xf32>
    %4 = vector.shape_cast %3 : vector<1x7x256xf32> to vector<7x256xf32>
    %5 = vector.extract_strided_slice %2 {offsets = [0, 0], sizes = [1, 256], strides = [1, 1]} : vector<7x256xf32> to vector<1x256xf32>
    %cst = arith.constant 1.495000e+04 : f32
    %6 = vector.broadcast %cst : f32 to vector<1x256xf32>
    %7 = arith.mulf %6, %5 : vector<1x256xf32>
    %8 = vector.extract_strided_slice %2 {offsets = [1, 0], sizes = [1, 256], strides = [1, 1]} : vector<7x256xf32> to vector<1x256xf32>
    %cst_7 = arith.constant 2.495000e+04 : f32
    %9 = vector.broadcast %cst_7 : f32 to vector<1x256xf32>
    %10 = arith.mulf %9, %8 : vector<1x256xf32>
    %11 = arith.addf %7, %10 : vector<1x256xf32>
    %12 = vector.extract_strided_slice %2 {offsets = [2, 0], sizes = [1, 256], strides = [1, 1]} : vector<7x256xf32> to vector<1x256xf32>
    %cst_8 = arith.constant 2.000000e+04 : f32
    %13 = vector.broadcast %cst_8 : f32 to vector<1x256xf32>
    %14 = arith.mulf %13, %12 : vector<1x256xf32>
    %15 = arith.addf %11, %14 : vector<1x256xf32>
    %16 = vector.extract_strided_slice %2 {offsets = [3, 0], sizes = [1, 256], strides = [1, 1]} : vector<7x256xf32> to vector<1x256xf32>
    %cst_9 = arith.constant 1.500000e+04 : f32
    %17 = vector.broadcast %cst_9 : f32 to vector<1x256xf32>
    %18 = arith.mulf %17, %16 : vector<1x256xf32>
    %19 = arith.addf %15, %18 : vector<1x256xf32>
    %20 = vector.extract_strided_slice %2 {offsets = [4, 0], sizes = [1, 256], strides = [1, 1]} : vector<7x256xf32> to vector<1x256xf32>
    %cst_10 = arith.constant 1.000000e+04 : f32
    %21 = vector.broadcast %cst_10 : f32 to vector<1x256xf32>
    %22 = arith.mulf %21, %20 : vector<1x256xf32>
    %23 = arith.addf %19, %22 : vector<1x256xf32>
    %24 = vector.extract_strided_slice %2 {offsets = [5, 0], sizes = [1, 256], strides = [1, 1]} : vector<7x256xf32> to vector<1x256xf32>
    %cst_11 = arith.constant 1.000000e+04 : f32
    %25 = vector.broadcast %cst_11 : f32 to vector<1x256xf32>
    %26 = arith.mulf %25, %24 : vector<1x256xf32>
    %27 = arith.addf %23, %26 : vector<1x256xf32>
    %28 = vector.extract_strided_slice %2 {offsets = [6, 0], sizes = [1, 256], strides = [1, 1]} : vector<7x256xf32> to vector<1x256xf32>
    %cst_12 = arith.constant 5.000000e+03 : f32
    %29 = vector.broadcast %cst_12 : f32 to vector<1x256xf32>
    %30 = arith.mulf %29, %28 : vector<1x256xf32>
    %31 = arith.addf %27, %30 : vector<1x256xf32>
    %32 = arith.mulf %31, %0 : vector<1x256xf32>
    %33 = vector.shape_cast %32 : vector<1x256xf32> to vector<1x1x256xf32>
    %cst_13 = arith.constant dense<0.000000e+00> : vector<1xf32>
    %34 = vector.multi_reduction <add>, %33, %cst_13 [1, 2] : vector<1x1x256xf32> to vector<1xf32>
    %35 = vector.shape_cast %34 : vector<1xf32> to vector<1x1x1xf32>
    %36 = vector.extract %35[0, 0, 0] : f32 from vector<1x1x1xf32>
    %37 = vector.extract_strided_slice %4 {offsets = [0, 0], sizes = [1, 256], strides = [1, 1]} : vector<7x256xf32> to vector<1x256xf32>
    %cst_14 = arith.constant 1.495000e+04 : f32
    %38 = vector.broadcast %cst_14 : f32 to vector<1x256xf32>
    %39 = arith.mulf %38, %37 : vector<1x256xf32>
    %40 = vector.extract_strided_slice %4 {offsets = [1, 0], sizes = [1, 256], strides = [1, 1]} : vector<7x256xf32> to vector<1x256xf32>
    %cst_15 = arith.constant 2.495000e+04 : f32
    %41 = vector.broadcast %cst_15 : f32 to vector<1x256xf32>
    %42 = arith.mulf %41, %40 : vector<1x256xf32>
    %43 = arith.addf %39, %42 : vector<1x256xf32>
    %44 = vector.extract_strided_slice %4 {offsets = [2, 0], sizes = [1, 256], strides = [1, 1]} : vector<7x256xf32> to vector<1x256xf32>
    %cst_16 = arith.constant 2.000000e+04 : f32
    %45 = vector.broadcast %cst_16 : f32 to vector<1x256xf32>
    %46 = arith.mulf %45, %44 : vector<1x256xf32>
    %47 = arith.addf %43, %46 : vector<1x256xf32>
    %48 = vector.extract_strided_slice %4 {offsets = [3, 0], sizes = [1, 256], strides = [1, 1]} : vector<7x256xf32> to vector<1x256xf32>
    %cst_17 = arith.constant 1.500000e+04 : f32
    %49 = vector.broadcast %cst_17 : f32 to vector<1x256xf32>
    %50 = arith.mulf %49, %48 : vector<1x256xf32>
    %51 = arith.addf %47, %50 : vector<1x256xf32>
    %52 = vector.extract_strided_slice %4 {offsets = [4, 0], sizes = [1, 256], strides = [1, 1]} : vector<7x256xf32> to vector<1x256xf32>
    %cst_18 = arith.constant 5.000000e+03 : f32
    %53 = vector.broadcast %cst_18 : f32 to vector<1x256xf32>
    %54 = arith.mulf %53, %52 : vector<1x256xf32>
    %55 = arith.addf %51, %54 : vector<1x256xf32>
    %56 = arith.mulf %55, %0 : vector<1x256xf32>
    %57 = vector.shape_cast %56 : vector<1x256xf32> to vector<1x1x256xf32>
    %cst_19 = arith.constant dense<0.000000e+00> : vector<1xf32>
    %58 = vector.multi_reduction <add>, %57, %cst_19 [1, 2] : vector<1x1x256xf32> to vector<1xf32>
    %59 = vector.shape_cast %58 : vector<1xf32> to vector<1x1x1xf32>
    %60 = vector.extract %59[0, 0, 0] : f32 from vector<1x1x1xf32>
    %61 = vector.extract_strided_slice %4 {offsets = [4, 0], sizes = [1, 256], strides = [1, 1]} : vector<7x256xf32> to vector<1x256xf32>
    %cst_20 = arith.constant 5.000000e+03 : f32
    %62 = vector.broadcast %cst_20 : f32 to vector<1x256xf32>
    %63 = arith.mulf %62, %61 : vector<1x256xf32>
    %64 = vector.extract_strided_slice %4 {offsets = [5, 0], sizes = [1, 256], strides = [1, 1]} : vector<7x256xf32> to vector<1x256xf32>
    %cst_21 = arith.constant 1.000000e+04 : f32
    %65 = vector.broadcast %cst_21 : f32 to vector<1x256xf32>
    %66 = arith.mulf %65, %64 : vector<1x256xf32>
    %67 = arith.addf %63, %66 : vector<1x256xf32>
    %68 = vector.extract_strided_slice %4 {offsets = [6, 0], sizes = [1, 256], strides = [1, 1]} : vector<7x256xf32> to vector<1x256xf32>
    %cst_22 = arith.constant 5.000000e+03 : f32
    %69 = vector.broadcast %cst_22 : f32 to vector<1x256xf32>
    %70 = arith.mulf %69, %68 : vector<1x256xf32>
    %71 = arith.addf %67, %70 : vector<1x256xf32>
    %72 = arith.mulf %71, %0 : vector<1x256xf32>
    %73 = vector.shape_cast %72 : vector<1x256xf32> to vector<1x1x256xf32>
    %cst_23 = arith.constant dense<0.000000e+00> : vector<1xf32>
    %74 = vector.multi_reduction <add>, %73, %cst_23 [1, 2] : vector<1x1x256xf32> to vector<1xf32>
    %75 = vector.shape_cast %74 : vector<1xf32> to vector<1x1x1xf32>
    %76 = vector.extract %75[0, 0, 0] : f32 from vector<1x1x1xf32>
    %cst_24 = arith.constant 2.000000e+04 : f32
    %77 = arith.subf %cst_24, %36 : f32
    %78 = arith.addf %77, %60 : f32
    %cst_25 = arith.constant 2.000000e+04 : f32
    %79 = arith.subf %cst_25, %76 : f32
    %80 = arith.divf %78, %79 : f32
    %81 = vector.extract_strided_slice %4 {offsets = [4, 0], sizes = [3, 256], strides = [1, 1]} : vector<7x256xf32> to vector<3x256xf32>
    %cst_26 = arith.constant 1.000000e+00 : f32
    %82 = vector.broadcast %cst_26 : f32 to vector<3x256xf32>
    %83 = arith.subf %82, %81 : vector<3x256xf32>
    %84 = vector.broadcast %80 : f32 to vector<3x256xf32>
    %85 = arith.mulf %83, %84 : vector<3x256xf32>
    %cst_27 = arith.constant 1.000000e+00 : f32
    %86 = vector.broadcast %cst_27 : f32 to vector<3x256xf32>
    %87 = arith.subf %86, %85 : vector<3x256xf32>
    %c0_28 = arith.constant 0 : index
    %c0_29 = arith.constant 0 : index
    %c0_30 = arith.constant 0 : index
    %88 = vector.load %arg4[%c0_28, %c0_29, %c0_30] : memref<1x3x256xf32, #tpu.memory_space<vmem>>, vector<1x3x256xf32>
    %89 = vector.shape_cast %88 : vector<1x3x256xf32> to vector<3x256xf32>
    %90 = vector.shape_cast %87 : vector<3x256xf32> to vector<1x3x256xf32>
    tpu.vector_store %arg4[%c0_28, %c0_29, %c0_30], %90 {strides = array<i32>} : memref<1x3x256xf32, #tpu.memory_space<vmem>>, vector<1x3x256xf32>,
    return
  }
  func.func @transform_0(%arg0: i32) -> (i32, i32, i32) {
    %c0_i32 = arith.constant 0 : i32
    %c0_i32_0 = arith.constant 0 : i32
    %c0_i32_1 = arith.constant 0 : i32
    return %arg0, %c0_i32, %c0_i32_0 : i32, i32, i32
  }
  func.func @transform_1(%arg0: i32) -> (i32, i32, i32) {
    %c0_i32 = arith.constant 0 : i32
    %c0_i32_0 = arith.constant 0 : i32
    %c0_i32_1 = arith.constant 0 : i32
    return %arg0, %c0_i32, %c0_i32_0 : i32, i32, i32
  }
  func.func @transform_2(%arg0: i32) -> (i32, i32) {
    %c0_i32 = arith.constant 0 : i32
    %c0_i32_0 = arith.constant 0 : i32
    %c0_i32_1 = arith.constant 0 : i32
    return %c0_i32, %c0_i32_0 : i32, i32
  }
  func.func @transform_3(%arg0: i32) -> (i32, i32, i32) {
    %c0_i32 = arith.constant 0 : i32
    %c0_i32_0 = arith.constant 0 : i32
    %c0_i32_1 = arith.constant 0 : i32
    return %arg0, %c0_i32, %c0_i32_0 : i32, i32, i32
  }
}

</mosaic_0001>

<bundles_post_ra>
// kernel: tpu_custom_call.1
= control target key start
LH: loop header
LB: loop body
LE: loop exit
PB: predicated region body
PF: predicated region fallthrough
CT: control target
= control target key end

     0   :  { %s520_s12 = smov 0   ;;  %s591_s0 = inlined_call_operand.vmem [shape: f32[2,7,256], index: 0, kind: input, shape index: {}]   ;;  %s592_s1 = inlined_call_operand.vmem [shape: f32[2,7,256], index: 1, kind: input, shape index: {}]   ;;  %s593_s2 = inlined_call_operand.vmem [shape: f32[1,256], index: 2, kind: input, shape index: {}]   ;;  %s594_s3 = inlined_call_operand.vmem [shape: f32[2,3,256], index: 3, kind: output, shape index: {}]  }
   0x1 LB: > { %s458_s13 = sadd.s32 4294967295, %s498_s12   ;;  %p462_p0 = scmp.ge.s32.totalorder %s498_s12, 1  ;;  %s498_s12 = sphi %s520_s12, %s13_s12  }
   0x2   : > { %p147_p1 = scmp.lt.s32.totalorder %s498_s12, 3 }
   0x4   : > { %p148_p2 = pnand %p462_p0, %p147_p1 }
   0x5   : > { %p176_p3 = scmp.lt.s32.totalorder (!%p148_p2), %s458_s13, 1  ;;  %v255_v0 = vlaneseq (!%p148_p2)  ;;  %v191_v2 = vld [vmem:[%s593_s2] sm:$0x3] (!%p148_p2)  ;;  %vm267_vm0 = vcmask (!%p148_p2), 1040384  }
   0x6   : > { %151 = sbr.rel (%p148_p2) target bundleno = 327 (0x147), region = 32 }
   0x7   : > { %v256_v1 = vshrl.u32 (!%p148_p2), %v255_v0, 7 }
   0x9   : > { %v257_v3 = vsub.s32 (!%p148_p2), 0, %v256_v1  ;;  %v261_v4 = vsub.s32 (!%p148_p2), 1, %v256_v1 }
   0xb   : > { %v544_v7 = vrot.slane (!%p148_p2), %v191_v2, %v257_v3  ;;  %v554_v14 = vrot.slane (!%p148_p2), %v191_v2, %v261_v4 }
   0xd   : > { %s596_s13 = smov (!%p176_p3, %s458_s13), 1 }
   0xe   : > { %s471_s16 = sshll.u32 %s596_s13, 4  ;;  %s473_s4 = sshll.u32 %s596_s13, 3 }
   0xf   : > { %s185_s19 = scalar_lea.vmem %s592_s1, %s471_s16  ;;  %s180_s22 = scalar_lea.vmem %s591_s0, %s471_s16 }
  0x10   : > { %v540_v5 = vld [vmem:[%s185_s19] sm:$0x7f]  ;;  %v542_v6 = vld [vmem:[%s185_s19 + $0x8] sm:$0x7f]  ;;  %s190_s7 = scalar_lea.vmem %s594_s3, %s473_s4 }
  0x11   : > { %v192_v8 = vld [vmem:[%s180_s22] sm:$0x7f]  ;;  %v547_v9 = vmul.f32 5000.0, %v540_v5  ;;  %v550_v10 = vmul.f32 5000.0, %v542_v6  ;;  %v336_v11 = vmul.f32 10000.0, %v540_v5  ;;  %v337_v12 = vmul.f32 10000.0, %v542_v6 }
  0x12   : > { %v193_v13 = vld [vmem:[%s180_s22 + $0x8] sm:$0x7f]  ;;  %v196_v15 = vmul.f32 14950.0, %v192_v8  ;;  %v198_v17 = vmul.f32 24950.0, %v192_v8 }
  0x13   : > { %v197_v16 = vmul.f32 14950.0, %v193_v13  ;;  %v340_v18 = vrot.slane %v336_v11, 1  ;;  %v341_v19 = vrot.slane %v337_v12, 1  ;;  %v346_v20 = vrot.slane %v547_v9, 2 }
  0x14   : > { %v347_v21 = vrot.slane %v550_v10, 2  ;;  %v199_v22 = vmul.f32 24950.0, %v193_v13  ;;  %v202_v23 = vrot.slane %v198_v17, 1  ;;  %v208_v24 = vmul.f32 20000.0, %v192_v8 }
  0x15   : > { %v209_v25 = vmul.f32 20000.0, %v193_v13  ;;  %v344_v26 = vadd.f32 %v340_v18, %v547_v9  ;;  %v345_v27 = vadd.f32 %v341_v19, %v550_v10  ;;  %v218_v28 = vmul.f32 15000.0, %v192_v8 }
  0x16   : > { %v219_v29 = vmul.f32 15000.0, %v193_v13  ;;  %v203_v30 = vrot.slane %v199_v22, 1  ;;  %v206_v31 = vadd.f32 %v202_v23, %v196_v15  ;;  %v212_v32 = vrot.slane %v208_v24, 2 }
  0x17   : > { %v213_v33 = vrot.slane %v209_v25, 2  ;;  %v350_v34 = vadd.f32 %v346_v20, %v344_v26  ;;  %v351_v35 = vadd.f32 %v347_v21, %v345_v27  ;;  %v222_v36 = vrot.slane %v218_v28, 3 }
  0x18   : > { %v223_v37 = vrot.slane %v219_v29, 3  ;;  %v207_v38 = vadd.f32 %v203_v30, %v197_v16  ;;  %v216_v39 = vadd.f32 %v212_v32, %v206_v31  ;;  %v228_v40 = vmul.f32 10000.0, %v192_v8 }
  0x19   : > { %v229_v41 = vmul.f32 10000.0, %v193_v13  ;;  %v352_v42 = vmul.f32 %v350_v34, %v544_v7  ;;  %v353_v43 = vmul.f32 %v351_v35, %v554_v14  ;;  %v244_v44 = vmul.f32 5000.0, %v192_v8 }
  0x1a   : > { %v245_v45 = vmul.f32 5000.0, %v193_v13  ;;  %v217_v46 = vadd.f32 %v213_v33, %v207_v38  ;;  %v226_v47 = vadd.f32 %v222_v36, %v216_v39  ;;  %v232_v48 = vrot.slane %v228_v40, 4 }
  0x1b   : > { %v233_v49 = vrot.slane %v229_v41, 4  ;;  %v356_v50 = vrot.slane %v352_v42, 4  ;;  %v357_v51 = vrot.slane %v353_v43, 4  ;;  %v238_v52 = vrot.slane %v228_v40, 5 }
  0x1c   : > { %v239_v53 = vrot.slane %v229_v41, 5  ;;  %v227_v54 = vadd.f32 %v223_v37, %v217_v46  ;;  %v236_v55 = vadd.f32 %v232_v48, %v226_v47  ;;  %v248_v56 = vrot.slane %v244_v44, 6 }
  0x1d   : > { %v249_v57 = vrot.slane %v245_v45, 6  ;;  %v360_v58 = vsel %vm267_vm0, %v356_v50, 0.0  ;;  %v361_v59 = vsel %vm267_vm0, %v357_v51, 0.0  ;;  %v280_v60 = vmul.f32 14950.0, %v540_v5 }
  0x1e   : > { %v281_v61 = vmul.f32 14950.0, %v542_v6  ;;  %v362_v62 = vadd.f32 %v361_v59, %v360_v58  ;;  %v237_v63 = vadd.f32 %v233_v49, %v227_v54  ;;  %v242_v0 = vadd.f32 %v238_v52, %v236_v55 }
  0x1f   : > { %v282_v1 = vmul.f32 24950.0, %v540_v5  ;;  %v283_v2 = vmul.f32 24950.0, %v542_v6  ;;  %v292_v3 = vmul.f32 20000.0, %v540_v5  ;;  %v293_v4 = vmul.f32 20000.0, %v542_v6 }
  0x20   : > { %v302_v8 = vmul.f32 15000.0, %v540_v5  ;;  %363 = vadd.xlane.f32.xlu1 %v362_v62  ;;  %v243_v11 = vadd.f32 %v239_v53, %v237_v63  ;;  %v252_v12 = vadd.f32 %v248_v56, %v242_v0  ;;  %v303_v15 = vmul.f32 15000.0, %v542_v6 }
  0x21   : > { %v286_v13 = vrot.slane %v282_v1, 1  ;;  %v287_v16 = vrot.slane %v283_v2, 1  ;;  %v296_v17 = vrot.slane %v292_v3, 2  ;;  %v297_v18 = vrot.slane %v293_v4, 2 }
  0x22   : > { %v253_v19 = vadd.f32 %v249_v57, %v243_v11  ;;  %v265_v20 = vmul.f32 %v544_v7, %v252_v12  ;;  %v306_v22 = vrot.slane %v302_v8, 3  ;;  %v307_v24 = vrot.slane %v303_v15, 3 }
  0x23   : > { %v290_v21 = vadd.f32 %v286_v13, %v280_v60  ;;  %v291_v23 = vadd.f32 %v287_v16, %v281_v61  ;;  %v316_v28 = vrot.slane %v547_v9, 4  ;;  %v317_v30 = vrot.slane %v550_v10, 4 }
  0x24   : > { %v266_v25 = vmul.f32 %v554_v14, %v253_v19  ;;  %v268_v26 = vsel %vm267_vm0, %v265_v20, 0.0  ;;  %v379_v61 = vsub.f32 1.0, %v540_v5  ;;  %v380_v62 = vsub.f32 1.0, %v542_v6 }
  0x25   : > { %v300_v27 = vadd.f32 %v296_v17, %v290_v21  ;;  %v301_v29 = vadd.f32 %v297_v18, %v291_v23 }
  0x26   : > { %v269_v31 = vsel %vm267_vm0, %v266_v25, 0.0 }
  0x27   : > { %v310_v32 = vadd.f32 %v306_v22, %v300_v27  ;;  %v270_v33 = vadd.f32 %v269_v31, %v268_v26  ;;  %v311_v34 = vadd.f32 %v307_v24, %v301_v29 }
  0x29   : > { %v320_v35 = vadd.f32 %v316_v28, %v310_v32  ;;  %271 = vadd.xlane.f32.xlu0 %v270_v33  ;;  %v321_v36 = vadd.f32 %v317_v30, %v311_v34 }
  0x2b   : > { %v322_v37 = vmul.f32 %v320_v35, %v544_v7  ;;  %v323_v38 = vmul.f32 %v321_v36, %v554_v14 }
  0x2d   : > { %v324_v39 = vsel %vm267_vm0, %v322_v37, 0.0  ;;  %v325_v40 = vsel %vm267_vm0, %v323_v38, 0.0 }
  0x2e   : > { %v326_v9 = vadd.f32 %v325_v40, %v324_v39 }
  0x30   : > { %327 = vadd.xlane.f32.xlu0 %v326_v9 }
  0xad   : > { %v364_v41 = vpop.xlane.xlu1 %363 }
  0xae   : > { %v365_v10 = vrot.slane %v364_v41, 4 }
  0xb0   : > { %v366_v44 = vadd.f32 %v365_v10, %v364_v41 }
  0xb2   : > { %v367_v47 = vrot.slane %v366_v44, 2 }
  0xb4   : > { %v368_v14 = vadd.f32 %v367_v47, %v366_v44 }
  0xb6   : > { %v272_v42 = vpop.xlane.xlu0 %271  ;;  %v369_v55 = vrot.slane %v368_v14, 1 }
  0xb7   : > { %v273_v43 = vrot.slane %v272_v42, 4 }
  0xb8   : > { %v370_v58 = vadd.f32 %v369_v55, %v368_v14 }
  0xb9   : > { %v274_v45 = vadd.f32 %v273_v43, %v272_v42 }
  0xbb   : > { %v275_v46 = vrot.slane %v274_v45, 2 }
  0xbd   : > { %v328_v48 = vpop.xlane.xlu0 %327  ;;  %v276_v49 = vadd.f32 %v275_v46, %v274_v45 }
  0xbe   : > { %v329_v50 = vrot.slane %v328_v48, 4 }
  0xbf   : > { %v277_v7 = vrot.slane %v276_v49, 1 }
  0xc0   : > { %v330_v51 = vadd.f32 %v329_v50, %v328_v48 }
  0xc1   : > { %v278_v52 = vadd.f32 %v277_v7, %v276_v49 }
  0xc2   : > { %v331_v53 = vrot.slane %v330_v51, 2 }
  0xc3   : > { %474 = vpush %v278_v52 }
  0xc4   : > { %v332_v54 = vadd.f32 %v331_v53, %v330_v51 }
  0xc6   : > { %v333_v56 = vrot.slane %v332_v54, 1 }
  0xc8   : > { %v334_v57 = vadd.f32 %v333_v56, %v332_v54 }
  0xca   : > { %476 = vpush %v334_v57 }
  0xcb   : > { %478 = vpush %v370_v58 }
  0xf4   : > { %s475_s23 = spop %474 }
  0xf5   : > { %s372_s27 = ssub.f32 20000.0, %s475_s23 }
  0xfb   : > { %s477_s24 = spop %476 }
  0xfc   : > { %s479_s25 = spop %478  ;;  %s373_s28 = sadd.f32 %s477_s24, %s372_s27 }
  0xfd   : > { %s374_s26 = ssub.f32 20000.0, %s479_s25 }
  0xff   : > { %v375_v59 = vstv %s374_s26 }
 0x100   : > { %490 = vrcp.f32 %v375_v59 }
 0x10a   : > { %v491_v60 = vpop.eup %490 }
 0x10b   : > { %480 = vpush %v491_v60 }
 0x13c   : > { %s481_s29 = spop %480 }
 0x13d   : > { %s378_s30 = smul.f32 %s481_s29, %s373_s28 }
 0x13f   : > { %v381_v63 = vstv %s378_s30 }
 0x140   : > { %v382_v0 = vmul.f32 %v381_v63, %v379_v61  ;;  %v383_v1 = vmul.f32 %v381_v63, %v380_v62 }
 0x142   : > { %v384_v2 = vsub.f32 1.0, %v382_v0  ;;  %v385_v3 = vsub.f32 1.0, %v383_v1 }
 0x144   : > { %v388_v4 = vcombine.high %v384_v2, %v385_v3 }
 0x146   : > { %390 = vst [vmem:[%s190_s7] sm:$0x77] %v388_v4 }
 0x147 PF: > { %s13_s12 = sadd.s32 1, %s498_s12  }
 0x148   : > { %p10_p4 = scmp.ge.s32.totalorder %s13_s12, 4  }
 0x14a   :  { %12 = sbr.rel (!%p10_p4) target bundleno = 1 (0x1), region = 65 }

</bundles_post_ra>
